<compile_context>
chip_gen: v7x
topology: tpu7x:2x2x1
jax: 0.10.0
libtpu: 0.0.40
codegen_flags: <defaults>
</compile_context>

<pallas_src>
import jax
import jax.numpy as jnp
from jax.experimental import pallas as pl
from jax.experimental.pallas import tpu as pltpu

IN_DIM = 28 * 28
HID = 64
OUT_DIM = 10


def mlp_kernel(x_ref,
               w1_ref, b1_ref,
               w2_ref, b2_ref,
               w3_ref, b3_ref,
               w4_ref, b4_ref,
               o_ref):
    """One batch tile: 3x (Linear + ReLU) -> Linear -> log_softmax(dim=1)."""
    dot_dtype = w1_ref.dtype            # f32 by default; bf16 if weights are bf16
    x = x_ref[...].astype(dot_dtype)

    h = jnp.dot(x, w1_ref[...], preferred_element_type=jnp.float32) + b1_ref[...]
    h = jnp.maximum(h, 0.0)

    h = jnp.dot(h.astype(dot_dtype), w2_ref[...],
                preferred_element_type=jnp.float32) + b2_ref[...]
    h = jnp.maximum(h, 0.0)

    h = jnp.dot(h.astype(dot_dtype), w3_ref[...],
                preferred_element_type=jnp.float32) + b3_ref[...]
    h = jnp.maximum(h, 0.0)

    z = jnp.dot(h.astype(dot_dtype), w4_ref[...],
                preferred_element_type=jnp.float32) + b4_ref[...]

    # Numerically-stable log_softmax over the class axis (last axis here).
    m = jnp.max(z, axis=-1, keepdims=True)
    lse = m + jnp.log(jnp.sum(jnp.exp(z - m), axis=-1, keepdims=True))
    o_ref[...] = (z - lse).astype(o_ref.dtype)


def net_forward(x, params, *, tile_b=512):
    """x: (B, 784) f32.  params: dict of (in,out) weights and (1,out) biases."""
    B = x.shape[0]

    # Pick a batch tile: either the whole array (block == full dims, always
    # legal) or a multiple of 8 so the (8,128) block constraint is satisfied.
    tb = min(tile_b, B)
    if tb != B and tb % 8 != 0:
        tb = max(8, (tb // 8) * 8)
    num_tiles = pl.cdiv(B, tb)
    Bp = num_tiles * tb
    if Bp != B:
        x = jnp.pad(x, ((0, Bp - B), (0, 0)))

    # x / out are tiled over the batch grid; weights/biases are grid-invariant
    # (constant index_map -> stay VMEM-resident across all steps).
    x_spec = pl.BlockSpec((tb, IN_DIM), lambda i: (i, 0))
    o_spec = pl.BlockSpec((tb, OUT_DIM), lambda i: (i, 0))

    def const_spec(shape):
        return pl.BlockSpec(shape, lambda i: (0, 0))

    param_bytes = sum(int(params[k].size) * params[k].dtype.itemsize
                      for k in params)
    cost = pl.CostEstimate(
        flops=2 * Bp * (IN_DIM * HID + HID * HID * 2 + HID * OUT_DIM),
        transcendentals=Bp * (OUT_DIM + 1),            # exp per class + log per row
        bytes_accessed=Bp * (IN_DIM + OUT_DIM) * 4 + param_bytes,
    )

    out = pl.pallas_call(
        mlp_kernel,
        out_shape=jax.ShapeDtypeStruct((Bp, OUT_DIM), jnp.float32),
        grid=(num_tiles,),
        in_specs=[
            x_spec,
            const_spec((IN_DIM, HID)),  const_spec((1, HID)),
            const_spec((HID, HID)),     const_spec((1, HID)),
            const_spec((HID, HID)),     const_spec((1, HID)),
            const_spec((HID, OUT_DIM)), const_spec((1, OUT_DIM)),
        ],
        out_specs=o_spec,
        compiler_params=pltpu.CompilerParams(
            dimension_semantics=("parallel",)),
        cost_estimate=cost,
    )(x,
      params["w1"], params["b1"],
      params["w2"], params["b2"],
      params["w3"], params["b3"],
      params["w4"], params["b4"])
    return out[:B]


def init_params(key, dtype=jnp.float32):
    """Deterministic parameter init (Linear shapes from the torch module).

    Use dtype=jnp.bfloat16 on v6e/v7x to halve weight DMA and hit the bf16 MXU
    rate; accumulation stays f32 inside the kernel.
    """
    dims = [(IN_DIM, HID), (HID, HID), (HID, HID), (HID, OUT_DIM)]
    params = {}
    for i, (fan_in, fan_out) in enumerate(dims, start=1):
        key, kw, kb = jax.random.split(key, 3)
        bound = 1.0 / jnp.sqrt(fan_in)
        # stored as (in, out) so the kernel does x @ W
        params[f"w{i}"] = jax.random.uniform(
            kw, (fan_in, fan_out), jnp.float32, -bound, bound).astype(dtype)
        params[f"b{i}"] = jax.random.uniform(
            kb, (1, fan_out), jnp.float32, -bound, bound)   # biases stay f32
    return params


def reference_forward(x, p):
    h = jnp.maximum(x @ p["w1"].astype(jnp.float32) + p["b1"], 0.0)
    h = jnp.maximum(h @ p["w2"].astype(jnp.float32) + p["b2"], 0.0)
    h = jnp.maximum(h @ p["w3"].astype(jnp.float32) + p["b3"], 0.0)
    z = h @ p["w4"].astype(jnp.float32) + p["b4"]
    return jax.nn.log_softmax(z, axis=1)


if __name__ == "__main__":
    key = jax.random.PRNGKey(0)
    key, kp = jax.random.split(key)
    params = init_params(kp)

    # 1) small batch, single grid step (block == full array)
    key, kx = jax.random.split(key)
    x = jax.random.normal(kx, (8, IN_DIM), jnp.float32)
    out = jax.block_until_ready(net_forward(x, params))
    ref = reference_forward(x, params)
    assert out.shape == (8, OUT_DIM)
    assert jnp.allclose(out, ref, atol=1e-4, rtol=1e-4)

    # 2) multi-tile grid (exercises batch BlockSpecs + resident weights)
    key, kx = jax.random.split(key)
    x = jax.random.normal(kx, (24, IN_DIM), jnp.float32)
    out = jax.block_until_ready(net_forward(x, params, tile_b=8))
    ref = reference_forward(x, params)
    assert jnp.allclose(out, ref, atol=1e-4, rtol=1e-4)

    # 3) batch not divisible by the tile (exercises pad + slice path)
    key, kx = jax.random.split(key)
    x = jax.random.normal(kx, (10, IN_DIM), jnp.float32)
    out = jax.block_until_ready(net_forward(x, params, tile_b=8))
    ref = reference_forward(x, params)
    assert out.shape == (10, OUT_DIM)
    assert jnp.allclose(out, ref, atol=1e-4, rtol=1e-4)

    print("KERNEL_OK")
</pallas_src>

<mosaic_0001>
module attributes {stable_mosaic.version = 11 : i64} {
  func.func @mlp_kernel(%arg0: i32, %arg1: memref<8x784xf32, #tpu.memory_space<vmem>>, %arg2: memref<784x64xf32, #tpu.memory_space<vmem>>, %arg3: memref<1x64xf32, #tpu.memory_space<vmem>>, %arg4: memref<64x64xf32, #tpu.memory_space<vmem>>, %arg5: memref<1x64xf32, #tpu.memory_space<vmem>>, %arg6: memref<64x64xf32, #tpu.memory_space<vmem>>, %arg7: memref<1x64xf32, #tpu.memory_space<vmem>>, %arg8: memref<64x10xf32, #tpu.memory_space<vmem>>, %arg9: memref<1x10xf32, #tpu.memory_space<vmem>>, %arg10: memref<8x10xf32, #tpu.memory_space<vmem>>) attributes {dimension_semantics = [#tpu.dimension_semantics<parallel>], iteration_bounds = array<i64: 1>, scalar_prefetch = 0 : i64, scratch_operands = 0 : i64, tpu.core_type = #tpu.core_type<tc>, window_params = [{transform_indices = @transform_0, window_bounds = array<i64: 8, 784>}, {pipeline_mode = #tpu.pipeline_mode<synchronous>, transform_indices = @transform_1, window_bounds = array<i64: 784, 64>}, {pipeline_mode = #tpu.pipeline_mode<synchronous>, transform_indices = @transform_2, window_bounds = array<i64: 1, 64>}, {pipeline_mode = #tpu.pipeline_mode<synchronous>, transform_indices = @transform_3, window_bounds = array<i64: 64, 64>}, {pipeline_mode = #tpu.pipeline_mode<synchronous>, transform_indices = @transform_4, window_bounds = array<i64: 1, 64>}, {pipeline_mode = #tpu.pipeline_mode<synchronous>, transform_indices = @transform_5, window_bounds = array<i64: 64, 64>}, {pipeline_mode = #tpu.pipeline_mode<synchronous>, transform_indices = @transform_6, window_bounds = array<i64: 1, 64>}, {pipeline_mode = #tpu.pipeline_mode<synchronous>, transform_indices = @transform_7, window_bounds = array<i64: 64, 10>}, {pipeline_mode = #tpu.pipeline_mode<synchronous>, transform_indices = @transform_8, window_bounds = array<i64: 1, 10>}, {transform_indices = @transform_9, window_bounds = array<i64: 8, 10>}]} {
    %c0 = arith.constant 0 : index
    %c0_0 = arith.constant 0 : index
    %0 = vector.load %arg1[%c0, %c0_0] : memref<8x784xf32, #tpu.memory_space<vmem>>, vector<8x784xf32>
    %c0_1 = arith.constant 0 : index
    %c0_2 = arith.constant 0 : index
    %1 = vector.load %arg2[%c0_1, %c0_2] : memref<784x64xf32, #tpu.memory_space<vmem>>, vector<784x64xf32>
    %cst = arith.constant dense<0.000000e+00> : vector<8x64xf32>
    %2 = tpu.matmul %0, %1, %cst {dimension_numbers = #tpu.dot_dimension_numbers<[1], [0], [0], [1], [0, 0, 1, 1], [], []>} : vector<8x784xf32>, vector<784x64xf32>, vector<8x64xf32> -> vector<8x64xf32>
    %c0_3 = arith.constant 0 : index
    %c0_4 = arith.constant 0 : index
    %3 = vector.load %arg3[%c0_3, %c0_4] : memref<1x64xf32, #tpu.memory_space<vmem>>, vector<1x64xf32>
    %4 = vector.broadcast %3 : vector<1x64xf32> to vector<8x64xf32>
    %5 = arith.addf %2, %4 : vector<8x64xf32>
    %cst_5 = arith.constant 0.000000e+00 : f32
    %6 = vector.broadcast %cst_5 : f32 to vector<8x64xf32>
    %7 = arith.maximumf %5, %6 : vector<8x64xf32>
    %c0_6 = arith.constant 0 : index
    %c0_7 = arith.constant 0 : index
    %8 = vector.load %arg4[%c0_6, %c0_7] : memref<64x64xf32, #tpu.memory_space<vmem>>, vector<64x64xf32>
    %cst_8 = arith.constant dense<0.000000e+00> : vector<8x64xf32>
    %9 = tpu.matmul %7, %8, %cst_8 {dimension_numbers = #tpu.dot_dimension_numbers<[1], [0], [0], [1], [0, 0, 1, 1], [], []>} : vector<8x64xf32>, vector<64x64xf32>, vector<8x64xf32> -> vector<8x64xf32>
    %c0_9 = arith.constant 0 : index
    %c0_10 = arith.constant 0 : index
    %10 = vector.load %arg5[%c0_9, %c0_10] : memref<1x64xf32, #tpu.memory_space<vmem>>, vector<1x64xf32>
    %11 = vector.broadcast %10 : vector<1x64xf32> to vector<8x64xf32>
    %12 = arith.addf %9, %11 : vector<8x64xf32>
    %cst_11 = arith.constant 0.000000e+00 : f32
    %13 = vector.broadcast %cst_11 : f32 to vector<8x64xf32>
    %14 = arith.maximumf %12, %13 : vector<8x64xf32>
    %c0_12 = arith.constant 0 : index
    %c0_13 = arith.constant 0 : index
    %15 = vector.load %arg6[%c0_12, %c0_13] : memref<64x64xf32, #tpu.memory_space<vmem>>, vector<64x64xf32>
    %cst_14 = arith.constant dense<0.000000e+00> : vector<8x64xf32>
    %16 = tpu.matmul %14, %15, %cst_14 {dimension_numbers = #tpu.dot_dimension_numbers<[1], [0], [0], [1], [0, 0, 1, 1], [], []>} : vector<8x64xf32>, vector<64x64xf32>, vector<8x64xf32> -> vector<8x64xf32>
    %c0_15 = arith.constant 0 : index
    %c0_16 = arith.constant 0 : index
    %17 = vector.load %arg7[%c0_15, %c0_16] : memref<1x64xf32, #tpu.memory_space<vmem>>, vector<1x64xf32>
    %18 = vector.broadcast %17 : vector<1x64xf32> to vector<8x64xf32>
    %19 = arith.addf %16, %18 : vector<8x64xf32>
    %cst_17 = arith.constant 0.000000e+00 : f32
    %20 = vector.broadcast %cst_17 : f32 to vector<8x64xf32>
    %21 = arith.maximumf %19, %20 : vector<8x64xf32>
    %c0_18 = arith.constant 0 : index
    %c0_19 = arith.constant 0 : index
    %22 = vector.load %arg8[%c0_18, %c0_19] : memref<64x10xf32, #tpu.memory_space<vmem>>, vector<64x10xf32>
    %cst_20 = arith.constant dense<0.000000e+00> : vector<8x10xf32>
    %23 = tpu.matmul %21, %22, %cst_20 {dimension_numbers = #tpu.dot_dimension_numbers<[1], [0], [0], [1], [0, 0, 1, 1], [], []>} : vector<8x64xf32>, vector<64x10xf32>, vector<8x10xf32> -> vector<8x10xf32>
    %c0_21 = arith.constant 0 : index
    %c0_22 = arith.constant 0 : index
    %24 = vector.load %arg9[%c0_21, %c0_22] : memref<1x10xf32, #tpu.memory_space<vmem>>, vector<1x10xf32>
    %25 = vector.broadcast %24 : vector<1x10xf32> to vector<8x10xf32>
    %26 = arith.addf %23, %25 : vector<8x10xf32>
    %cst_23 = arith.constant dense<0xFF800000> : vector<8xf32>
    %27 = vector.multi_reduction <maximumf>, %26, %cst_23 [1] : vector<8x10xf32> to vector<8xf32>
    %28 = vector.shape_cast %27 : vector<8xf32> to vector<8x1xf32>
    %29 = vector.broadcast %28 : vector<8x1xf32> to vector<8x10xf32>
    %30 = arith.subf %26, %29 : vector<8x10xf32>
    %31 = math.exp %30 : vector<8x10xf32>
    %cst_24 = arith.constant dense<0.000000e+00> : vector<8xf32>
    %32 = vector.multi_reduction <add>, %31, %cst_24 [1] : vector<8x10xf32> to vector<8xf32>
    %33 = vector.shape_cast %32 : vector<8xf32> to vector<8x1xf32>
    %34 = math.log %33 : vector<8x1xf32>
    %35 = arith.addf %28, %34 : vector<8x1xf32>
    %36 = vector.broadcast %35 : vector<8x1xf32> to vector<8x10xf32>
    %37 = arith.subf %26, %36 : vector<8x10xf32>
    %c0_25 = arith.constant 0 : index
    %c0_26 = arith.constant 0 : index
    %38 = vector.load %arg10[%c0_25, %c0_26] : memref<8x10xf32, #tpu.memory_space<vmem>>, vector<8x10xf32>
    tpu.vector_store %arg10[%c0_25, %c0_26], %37 {strides = array<i32>} : memref<8x10xf32, #tpu.memory_space<vmem>>, vector<8x10xf32>,
    return
  }
  func.func @transform_0(%arg0: i32) -> (i32, i32) {
    %c0_i32 = arith.constant 0 : i32
    %c0_i32_0 = arith.constant 0 : i32
    return %arg0, %c0_i32 : i32, i32
  }
  func.func @transform_1(%arg0: i32) -> (i32, i32) {
    %c0_i32 = arith.constant 0 : i32
    %c0_i32_0 = arith.constant 0 : i32
    %c0_i32_1 = arith.constant 0 : i32
    return %c0_i32, %c0_i32_0 : i32, i32
  }
  func.func @transform_2(%arg0: i32) -> (i32, i32) {
    %c0_i32 = arith.constant 0 : i32
    %c0_i32_0 = arith.constant 0 : i32
    %c0_i32_1 = arith.constant 0 : i32
    return %c0_i32, %c0_i32_0 : i32, i32
  }
  func.func @transform_3(%arg0: i32) -> (i32, i32) {
    %c0_i32 = arith.constant 0 : i32
    %c0_i32_0 = arith.constant 0 : i32
    %c0_i32_1 = arith.constant 0 : i32
    return %c0_i32, %c0_i32_0 : i32, i32
  }
  func.func @transform_4(%arg0: i32) -> (i32, i32) {
    %c0_i32 = arith.constant 0 : i32
    %c0_i32_0 = arith.constant 0 : i32
    %c0_i32_1 = arith.constant 0 : i32
    return %c0_i32, %c0_i32_0 : i32, i32
  }
  func.func @transform_5(%arg0: i32) -> (i32, i32) {
    %c0_i32 = arith.constant 0 : i32
    %c0_i32_0 = arith.constant 0 : i32
    %c0_i32_1 = arith.constant 0 : i32
    return %c0_i32, %c0_i32_0 : i32, i32
  }
  func.func @transform_6(%arg0: i32) -> (i32, i32) {
    %c0_i32 = arith.constant 0 : i32
    %c0_i32_0 = arith.constant 0 : i32
    %c0_i32_1 = arith.constant 0 : i32
    return %c0_i32, %c0_i32_0 : i32, i32
  }
  func.func @transform_7(%arg0: i32) -> (i32, i32) {
    %c0_i32 = arith.constant 0 : i32
    %c0_i32_0 = arith.constant 0 : i32
    %c0_i32_1 = arith.constant 0 : i32
    return %c0_i32, %c0_i32_0 : i32, i32
  }
  func.func @transform_8(%arg0: i32) -> (i32, i32) {
    %c0_i32 = arith.constant 0 : i32
    %c0_i32_0 = arith.constant 0 : i32
    %c0_i32_1 = arith.constant 0 : i32
    return %c0_i32, %c0_i32_0 : i32, i32
  }
  func.func @transform_9(%arg0: i32) -> (i32, i32) {
    %c0_i32 = arith.constant 0 : i32
    %c0_i32_0 = arith.constant 0 : i32
    return %arg0, %c0_i32 : i32, i32
  }
}

</mosaic_0001>

<bundles_post_ra>
// kernel: tpu_custom_call.1
= control target key start
LH: loop header
LB: loop body
LE: loop exit
PB: predicated region body
PF: predicated region fallthrough
CT: control target
= control target key end

     0   :  { %s1592_s0 = inlined_call_operand.vmem [shape: f32[8,784], index: 0, kind: input, shape index: {}]   ;;  %s1593_s1 = inlined_call_operand.vmem [shape: f32[784,64], index: 1, kind: input, shape index: {}]   ;;  %s1594_s2 = inlined_call_operand.vmem [shape: f32[1,64], index: 2, kind: input, shape index: {}]   ;;  %s1595_s3 = inlined_call_operand.vmem [shape: f32[64,64], index: 3, kind: input, shape index: {}]   ;;  %s1596_s4 = inlined_call_operand.vmem [shape: f32[1,64], index: 4, kind: input, shape index: {}]   ;;  %s1597_s5 = inlined_call_operand.vmem [shape: f32[64,64], index: 5, kind: input, shape index: {}]   ;;  %s1598_s6 = inlined_call_operand.vmem [shape: f32[1,64], index: 6, kind: input, shape index: {}]   ;;  %s1599_s7 = inlined_call_operand.vmem [shape: f32[64,10], index: 7, kind: input, shape index: {}]   ;;  %s1600_s8 = inlined_call_operand.vmem [shape: f32[1,10], index: 8, kind: input, shape index: {}]   ;;  %s1601_s9 = inlined_call_operand.hbm [shape: f32[8,10], index: 9, kind: output, shape index: {}]  }
   0x1   :  { %v56_v0 = vld [vmem:[%s1593_s1 + $0x80] sm:$0xff]  ;;  %v57_v1 = vld [vmem:[%s1593_s1 + $0x88] sm:$0xff]  ;;  %v58_v11 = vld [vmem:[%s1593_s1 + $0x90] sm:$0xff] }
   0x2   :  { %v40_v2 = vld [vmem:[%s1593_s1] sm:$0xff]  ;;  %v933_v3 = vpack.c.bf16 %v57_v1, %v56_v0  ;;  %v41_v4 = vld [vmem:[%s1593_s1 + $0x8] sm:$0xff]  ;;  %v59_v13 = vld [vmem:[%s1593_s1 + $0x98] sm:$0xff] }
   0x3   :  { %v88_v5 = vld [vmem:[%s1593_s1 + $0x180] sm:$0xff]  ;;  %v89_v6 = vld [vmem:[%s1593_s1 + $0x188] sm:$0xff]  ;;  %v935_v7 = vpack.c.bf16 %v41_v4, %v40_v2  ;;  %v42_v14 = vld [vmem:[%s1593_s1 + $0x10] sm:$0xff]  ;;  %v937_v16 = vpack.c.bf16 %v59_v13, %v58_v11 }
   0x4   :  { %v965_v8 = vpack.c.bf16 %v89_v6, %v88_v5  ;;  %v72_v9 = vld [vmem:[%s1593_s1 + $0x100] sm:$0xff]  ;;  %v73_v10 = vld [vmem:[%s1593_s1 + $0x108] sm:$0xff]  ;;  %934 = vmatprep.subr.bf16.mxu0 %v933_v3  ;;  %v43_v15 = vld [vmem:[%s1593_s1 + $0x18] sm:$0xff] }
   0x5   :  { %v967_v12 = vpack.c.bf16 %v73_v10, %v72_v9  ;;  %936 = vmatpush3.bf16.msra.mxu0 %v935_v7  ;;  %v939_v17 = vpack.c.bf16 %v43_v15, %v42_v14  ;;  %v90_v18 = vld [vmem:[%s1593_s1 + $0x190] sm:$0xff]  ;;  %v91_v19 = vld [vmem:[%s1593_s1 + $0x198] sm:$0xff]  ;;  %v60_v23 = vld [vmem:[%s1593_s1 + $0xa0] sm:$0xff] }
   0x6   :  { %966 = vmatprep.subr.bf16.mxu1 %v965_v8  ;;  %v74_v20 = vld [vmem:[%s1593_s1 + $0x110] sm:$0xff]  ;;  %v969_v21 = vpack.c.bf16 %v91_v19, %v90_v18  ;;  %v75_v22 = vld [vmem:[%s1593_s1 + $0x118] sm:$0xff]  ;;  %v61_v24 = vld [vmem:[%s1593_s1 + $0xa8] sm:$0xff]  ;;  %938 = vmatprep.subr.bf16.mxu0 %v937_v16 }
   0x7   :  { %968 = vmatpush3.bf16.msra.mxu1 %v967_v12  ;;  %v971_v25 = vpack.c.bf16 %v75_v22, %v74_v20  ;;  %v941_v26 = vpack.c.bf16 %v61_v24, %v60_v23  ;;  %v44_v27 = vld [vmem:[%s1593_s1 + $0x20] sm:$0xff]  ;;  %v45_v28 = vld [vmem:[%s1593_s1 + $0x28] sm:$0xff]  ;;  %v62_v35 = vld [vmem:[%s1593_s1 + $0xb0] sm:$0xff] }
   0x8   :  { %v92_v29 = vld [vmem:[%s1593_s1 + $0x1a0] sm:$0xff]  ;;  %970 = vmatprep.subr.bf16.mxu1 %v969_v21  ;;  %v93_v30 = vld [vmem:[%s1593_s1 + $0x1a8] sm:$0xff]  ;;  %v943_v33 = vpack.c.bf16 %v45_v28, %v44_v27  ;;  %v63_v36 = vld [vmem:[%s1593_s1 + $0xb8] sm:$0xff] }
   0x9   :  { %v76_v31 = vld [vmem:[%s1593_s1 + $0x120] sm:$0xff]  ;;  %v77_v32 = vld [vmem:[%s1593_s1 + $0x128] sm:$0xff]  ;;  %940 = vmatpush3.bf16.msra.mxu0 %v939_v17  ;;  %v973_v34 = vpack.c.bf16 %v93_v30, %v92_v29  ;;  %v46_v37 = vld [vmem:[%s1593_s1 + $0x30] sm:$0xff]  ;;  %v945_v39 = vpack.c.bf16 %v63_v36, %v62_v35 }
   0xa   :  { %942 = vmatprep.subr.bf16.mxu0 %v941_v26  ;;  %v975_v38 = vpack.c.bf16 %v77_v32, %v76_v31  ;;  %v47_v40 = vld [vmem:[%s1593_s1 + $0x38] sm:$0xff]  ;;  %v94_v41 = vld [vmem:[%s1593_s1 + $0x1b0] sm:$0xff]  ;;  %v64_v46 = vld [vmem:[%s1593_s1 + $0xc0] sm:$0xff] }
   0xb   :  { %972 = vmatpush3.bf16.msra.mxu1 %v971_v25  ;;  %v95_v42 = vld [vmem:[%s1593_s1 + $0x1b8] sm:$0xff]  ;;  %v78_v44 = vld [vmem:[%s1593_s1 + $0x130] sm:$0xff]  ;;  %v65_v47 = vld [vmem:[%s1593_s1 + $0xc8] sm:$0xff]  ;;  %v947_v48 = vpack.c.bf16 %v47_v40, %v46_v37 }
   0xc   :  { %974 = vmatprep.subr.bf16.mxu1 %v973_v34  ;;  %v977_v43 = vpack.c.bf16 %v95_v42, %v94_v41  ;;  %v79_v45 = vld [vmem:[%s1593_s1 + $0x138] sm:$0xff]  ;;  %v96_v49 = vld [vmem:[%s1593_s1 + $0x1c0] sm:$0xff]  ;;  %v97_v50 = vld [vmem:[%s1593_s1 + $0x1c8] sm:$0xff]  ;;  %v949_v52 = vpack.c.bf16 %v65_v47, %v64_v46 }
   0xd   :  { %944 = vmatpush3.bf16.msra.mxu0 %v943_v33  ;;  %v979_v51 = vpack.c.bf16 %v79_v45, %v78_v44  ;;  %v48_v53 = vld [vmem:[%s1593_s1 + $0x40] sm:$0xff]  ;;  %v49_v54 = vld [vmem:[%s1593_s1 + $0x48] sm:$0xff]  ;;  %v981_v56 = vpack.c.bf16 %v97_v50, %v96_v49  ;;  %v66_v58 = vld [vmem:[%s1593_s1 + $0xd0] sm:$0xff]  ;;  %v1100_v50 = vmov 0.0|0.0  }
   0xe   :  { %946 = vmatprep.subr.bf16.mxu0 %v945_v39  ;;  %v80_v55 = vld [vmem:[%s1593_s1 + $0x140] sm:$0xff]  ;;  %v81_v57 = vld [vmem:[%s1593_s1 + $0x148] sm:$0xff]  ;;  %v67_v59 = vld [vmem:[%s1593_s1 + $0xd8] sm:$0xff]  ;;  %v951_v62 = vpack.c.bf16 %v49_v54, %v48_v53 }
   0xf   :  { %976 = vmatpush3.bf16.msra.mxu1 %v975_v38  ;;  %v98_v60 = vld [vmem:[%s1593_s1 + $0x1d0] sm:$0xff]  ;;  %v99_v61 = vld [vmem:[%s1593_s1 + $0x1d8] sm:$0xff]  ;;  %v983_v63 = vpack.c.bf16 %v81_v57, %v80_v55  ;;  %v953_v0 = vpack.c.bf16 %v67_v59, %v66_v58  ;;  %v68_v6 = vld [vmem:[%s1593_s1 + $0xe0] sm:$0xff] }
  0x10   :  { %978 = vmatprep.subr.bf16.mxu1 %v977_v43  ;;  %v50_v1 = vld [vmem:[%s1593_s1 + $0x50] sm:$0xff]  ;;  %v51_v2 = vld [vmem:[%s1593_s1 + $0x58] sm:$0xff]  ;;  %v985_v4 = vpack.c.bf16 %v99_v61, %v98_v60  ;;  %v69_v7 = vld [vmem:[%s1593_s1 + $0xe8] sm:$0xff] }
  0x11   :  { %948 = vmatpush3.bf16.msra.mxu0 %v947_v48  ;;  %v82_v3 = vld [vmem:[%s1593_s1 + $0x150] sm:$0xff]  ;;  %v83_v5 = vld [vmem:[%s1593_s1 + $0x158] sm:$0xff]  ;;  %v100_v8 = vld [vmem:[%s1593_s1 + $0x1e0] sm:$0xff]  ;;  %v955_v10 = vpack.c.bf16 %v51_v2, %v50_v1  ;;  %v957_v14 = vpack.c.bf16 %v69_v7, %v68_v6 }
  0x12   :  { %950 = vmatprep.subr.bf16.mxu0 %v949_v52  ;;  %v101_v9 = vld [vmem:[%s1593_s1 + $0x1e8] sm:$0xff]  ;;  %v52_v11 = vld [vmem:[%s1593_s1 + $0x60] sm:$0xff]  ;;  %v987_v13 = vpack.c.bf16 %v83_v5, %v82_v3  ;;  %v70_v19 = vld [vmem:[%s1593_s1 + $0xf0] sm:$0xff] }
  0x13   :  { %980 = vmatpush3.bf16.msra.mxu1 %v979_v51  ;;  %v34_v12 = vld [vmem:[%s1592_s0 + $0x8] sm:$0xff]  ;;  %v84_v16 = vld [vmem:[%s1593_s1 + $0x160] sm:$0xff]  ;;  %v989_v18 = vpack.c.bf16 %v101_v9, %v100_v8  ;;  %v71_v20 = vld [vmem:[%s1593_s1 + $0xf8] sm:$0xff] }
  0x14   :  { %982 = vmatprep.subr.bf16.mxu1 %v981_v56  ;;  %v53_v15 = vld [vmem:[%s1593_s1 + $0x68] sm:$0xff]  ;;  %213 = vmatprep.mubr.f32.mxu0 %v34_v12  ;;  %v36_v21 = vld [vmem:[%s1592_s0 + $0x18] sm:$0xff]  ;;  %v102_v22 = vld [vmem:[%s1593_s1 + $0x1f0] sm:$0xff]  ;;  %v961_v26 = vpack.c.bf16 %v71_v20, %v70_v19 }
  0x15   :  { %952 = vmatpush3.bf16.msra.mxu0 %v951_v62  ;;  %v85_v17 = vld [vmem:[%s1593_s1 + $0x168] sm:$0xff]  ;;  %v103_v23 = vld [vmem:[%s1593_s1 + $0x1f8] sm:$0xff]  ;;  %283 = vmatprep.mubr.f32.mxu1 %v36_v21  ;;  %v959_v24 = vpack.c.bf16 %v53_v15, %v52_v11  ;;  %v54_v27 = vld [vmem:[%s1593_s1 + $0x70] sm:$0xff] }
  0x16   :  { %954 = vmatprep.subr.bf16.mxu0 %v953_v0  ;;  %v991_v25 = vpack.c.bf16 %v85_v17, %v84_v16  ;;  %v55_v28 = vld [vmem:[%s1593_s1 + $0x78] sm:$0xff]  ;;  %v86_v29 = vld [vmem:[%s1593_s1 + $0x170] sm:$0xff]  ;;  %v993_v30 = vpack.c.bf16 %v103_v23, %v102_v22  ;;  %v120_v32 = vld [vmem:[%s1593_s1 + $0x280] sm:$0xff] }
  0x17   :  { %984 = vmatpush3.bf16.msra.mxu1 %v983_v63  ;;  %v87_v31 = vld [vmem:[%s1593_s1 + $0x178] sm:$0xff]  ;;  %v121_v33 = vld [vmem:[%s1593_s1 + $0x288] sm:$0xff]  ;;  %v963_v34 = vpack.c.bf16 %v55_v28, %v54_v27  ;;  %v104_v37 = vld [vmem:[%s1593_s1 + $0x200] sm:$0xff] }
  0x18   :  { %986 = vmatprep.subr.bf16.mxu1 %v985_v4  ;;  %v995_v35 = vpack.c.bf16 %v87_v31, %v86_v29  ;;  %v997_v36 = vpack.c.bf16 %v121_v33, %v120_v32  ;;  %v105_v38 = vld [vmem:[%s1593_s1 + $0x208] sm:$0xff]  ;;  %v122_v39 = vld [vmem:[%s1593_s1 + $0x290] sm:$0xff]  ;;  %v123_v40 = vld [vmem:[%s1593_s1 + $0x298] sm:$0xff] }
  0x19   :  { %956 = vmatpush3.bf16.msra.mxu0 %v955_v10  ;;  %v33_v41 = vld [vmem:[%s1592_s0] sm:$0xff]  ;;  %v999_v42 = vpack.c.bf16 %v105_v38, %v104_v37  ;;  %v35_v43 = vld [vmem:[%s1592_s0 + $0x10] sm:$0xff]  ;;  %v1001_v45 = vpack.c.bf16 %v123_v40, %v122_v39  ;;  %v107_v46 = vld [vmem:[%s1593_s1 + $0x218] sm:$0xff] }
  0x1a   :  { %958 = vmatprep.subr.bf16.mxu0 %v957_v14  ;;  %v106_v44 = vld [vmem:[%s1593_s1 + $0x210] sm:$0xff]  ;;  %v124_v47 = vld [vmem:[%s1593_s1 + $0x2a0] sm:$0xff]  ;;  %v125_v48 = vld [vmem:[%s1593_s1 + $0x2a8] sm:$0xff] }
  0x1b   :  { %988 = vmatpush3.bf16.msra.mxu1 %v987_v13  ;;  %v38_v49 = vld [vmem:[%s1592_s0 + $0x28] sm:$0xff]  ;;  %v136_v51 = vld [vmem:[%s1593_s1 + $0x300] sm:$0xff] }
  0x1c   :  { %990 = vmatprep.subr.bf16.mxu1 %v989_v18  ;;  %v137_v52 = vld [vmem:[%s1593_s1 + $0x308] sm:$0xff] }
  0x1d   :  { %960 = vmatpush3.bf16.msra.mxu0 %v959_v24  ;;  %v1030_v53 = vpack.c.bf16 %v137_v52, %v136_v51 }
  0x1e   :  { %962 = vmatprep.subr.bf16.mxu0 %v961_v26 }
  0x1f   :  { %992 = vmatpush3.bf16.msra.mxu1 %v991_v25 }
  0x20   :  { %994 = vmatprep.subr.bf16.mxu1 %v993_v30 }
  0x21   :  { %964 = vmatpush3.bf16.msra.mxu0 %v963_v34 }
  0x22   :  { %998 = vmatprep.subr.bf16.mxu0 %v997_v36 }
  0x23   :  { %996 = vmatpush3.bf16.msra.mxu1 %v995_v35 }
  0x24   :  { %1029 = vmatprep.subr.bf16.mxu1 %v1100_v50  ;;  %214 = vmatmul.mubr.f32.vlgmr.msra.gmra.mrb[0].mxu0 %v33_v41 }
  0x25   :  { %14 = vsyncpa [#allocation3], 0  ;;  %1000 = vmatpush3.bf16.msra.mxu0 %v999_v42  ;;  %v1003_v54 = vpack.c.bf16 %v107_v46, %v106_v44  ;;  %v1005_v55 = vpack.c.bf16 %v125_v48, %v124_v47  ;;  %v108_v56 = vld [vmem:[%s1593_s1 + $0x220] sm:$0xff]  ;;  %v109_v57 = vld [vmem:[%s1593_s1 + $0x228] sm:$0xff]  ;;  %353 = vmatprep.mubr.f32.mxu0 %v38_v49  ;;  %vm1101_vm0 = vmmov 0   ;;  %v1102_v60 = vmov 0.0  }
  0x26   :  { %284 = vmatmul.mubr.f32.vlgmr.msra.gmra.mrb[0].mxu1 %v35_v43  ;;  %1002 = vmatprep.subr.bf16.mxu0 %v1001_v45  ;;  %v126_v58 = vld [vmem:[%s1593_s1 + $0x2b0] sm:$0xff]  ;;  %v127_v59 = vld [vmem:[%s1593_s1 + $0x2b8] sm:$0xff]  ;;  %vm145_vm1 = vcmask 130048   ;;  %v1007_v62 = vpack.c.bf16 %v109_v57, %v108_v56  ;;  %v128_v2 = vld [vmem:[%s1593_s1 + $0x2c0] sm:$0xff]  ;;  %vm445_vm2 = vcmask 523264   ;;  %vm697_vm3 = vcmask 80896  }
  0x27   :  { %1031 = vmatpush3.bf16.msra.mxu1 %v1030_v53  ;;  %873 = vmatprep.mubr.msk.f32.mxu1 %vm1101_vm0, %v1102_v60  ;;  %v39_v61 = vld [vmem:[%s1592_s0 + $0x30] sm:$0xff]  ;;  %v1009_v63 = vpack.c.bf16 %v127_v59, %v126_v58  ;;  %v111_v1 = vld [vmem:[%s1593_s1 + $0x238] sm:$0xff]  ;;  %v129_v3 = vld [vmem:[%s1593_s1 + $0x2c8] sm:$0xff] }
  0x28   :  { %1032 = vmatprep.subr.bf16.mxu1 %v1100_v50  ;;  %v110_v0 = vld [vmem:[%s1593_s1 + $0x230] sm:$0xff]  ;;  %v1013_v5 = vpack.c.bf16 %v129_v3, %v128_v2  ;;  %v112_v6 = vld [vmem:[%s1593_s1 + $0x240] sm:$0xff]  ;;  %v113_v7 = vld [vmem:[%s1593_s1 + $0x248] sm:$0xff] }
  0x29   :  { %1004 = vmatpush3.bf16.msra.mxu0 %v1003_v54  ;;  %v1011_v4 = vpack.c.bf16 %v111_v1, %v110_v0  ;;  %v130_v8 = vld [vmem:[%s1593_s1 + $0x2d0] sm:$0xff]  ;;  %v131_v9 = vld [vmem:[%s1593_s1 + $0x2d8] sm:$0xff]  ;;  %v1015_v10 = vpack.c.bf16 %v113_v7, %v112_v6  ;;  %v132_v14 = vld [vmem:[%s1593_s1 + $0x2e0] sm:$0xff] }
  0x2a   :  { %1006 = vmatprep.subr.bf16.mxu0 %v1005_v55  ;;  %874 = vmatmul.mubr.msk.f32.vlgmr.msra.gmra.mrb[2].mxu1 %vm145_vm1, %v39_v61  ;;  %v1017_v11 = vpack.c.bf16 %v131_v9, %v130_v8  ;;  %v114_v12 = vld [vmem:[%s1593_s1 + $0x250] sm:$0xff]  ;;  %v115_v13 = vld [vmem:[%s1593_s1 + $0x258] sm:$0xff]  ;;  %v133_v15 = vld [vmem:[%s1593_s1 + $0x2e8] sm:$0xff] }
  0x2b   :  { %892 = vmatprep.mubr.msk.f32.mxu1 %vm1101_vm0, %v1102_v60  ;;  %v1019_v16 = vpack.c.bf16 %v115_v13, %v114_v12  ;;  %v1021_v17 = vpack.c.bf16 %v133_v15, %v132_v14  ;;  %v116_v18 = vld [vmem:[%s1593_s1 + $0x260] sm:$0xff]  ;;  %v117_v19 = vld [vmem:[%s1593_s1 + $0x268] sm:$0xff]  ;;  %v134_v20 = vld [vmem:[%s1593_s1 + $0x2f0] sm:$0xff] }
  0x2c   :  { %v135_v21 = vld [vmem:[%s1593_s1 + $0x2f8] sm:$0xff]  ;;  %v1023_v22 = vpack.c.bf16 %v117_v19, %v116_v18  ;;  %v118_v24 = vld [vmem:[%s1593_s1 + $0x270] sm:$0xff]  ;;  %v37_v27 = vld [vmem:[%s1592_s0 + $0x20] sm:$0xff] }
  0x2d   :  { %1008 = vmatpush3.bf16.msra.mxu0 %v1007_v62  ;;  %v1025_v23 = vpack.c.bf16 %v135_v21, %v134_v20  ;;  %v119_v25 = vld [vmem:[%s1593_s1 + $0x278] sm:$0xff]  ;;  %v430_v28 = vld [vmem:[%s1595_s3] sm:$0xff]  ;;  %v431_v29 = vld [vmem:[%s1595_s3 + $0x8] sm:$0xff] }
  0x2e   :  { %1010 = vmatprep.subr.bf16.mxu0 %v1009_v63  ;;  %v1027_v26 = vpack.c.bf16 %v119_v25, %v118_v24  ;;  %v432_v30 = vld [vmem:[%s1595_s3 + $0x10] sm:$0xff]  ;;  %v1033_v31 = vpack.c.bf16 %v431_v29, %v430_v28  ;;  %v433_v32 = vld [vmem:[%s1595_s3 + $0x18] sm:$0xff]  ;;  %v434_v34 = vld [vmem:[%s1595_s3 + $0x20] sm:$0xff] }
  0x2f   :  { %v1036_v33 = vpack.c.bf16 %v433_v32, %v432_v30  ;;  %v435_v35 = vld [vmem:[%s1595_s3 + $0x28] sm:$0xff]  ;;  %v436_v37 = vld [vmem:[%s1595_s3 + $0x30] sm:$0xff]  ;;  %v437_v38 = vld [vmem:[%s1595_s3 + $0x38] sm:$0xff] }
  0x30   :  { %1034 = vmatpush3.bf16.msra.mxu1 %v1033_v31  ;;  %v1039_v36 = vpack.c.bf16 %v435_v35, %v434_v34  ;;  %v1042_v39 = vpack.c.bf16 %v437_v38, %v436_v37  ;;  %v726_v41 = vld [vmem:[%s1594_s2] ss:$0 sm:$0xff]  ;;  %v521_v57 = vld [vmem:[%s1597_s5 + $0x8] sm:$0xff]  ;;  %v522_v62 = vld [vmem:[%s1597_s5 + $0x10] sm:$0xff] }
  0x31   :  { %1012 = vmatpush3.bf16.msra.mxu0 %v1011_v4  ;;  %1035 = vmatprep.subr.bf16.mxu1 %v1100_v50  ;;  %v520_v56 = vld [vmem:[%s1597_s5] sm:$0xff]  ;;  %v523_v63 = vld [vmem:[%s1597_s5 + $0x18] sm:$0xff]  ;;  %v525_v2 = vld [vmem:[%s1597_s5 + $0x28] sm:$0xff] }
  0x32   :  { %1014 = vmatprep.subr.bf16.mxu0 %v1013_v5  ;;  %v1045_v59 = vpack.c.bf16 %v521_v57, %v520_v56  ;;  %v1048_v0 = vpack.c.bf16 %v523_v63, %v522_v62  ;;  %v524_v1 = vld [vmem:[%s1597_s5 + $0x20] sm:$0xff]  ;;  %v527_v4 = vld [vmem:[%s1597_s5 + $0x38] sm:$0xff]  ;;  %v610_v7 = vld [vmem:[%s1599_s7 + $0x8] sm:$0xff] }
  0x33   :  { %v1051_v3 = vpack.c.bf16 %v525_v2, %v524_v1  ;;  %v609_v6 = vld [vmem:[%s1599_s7] sm:$0xff]  ;;  %v611_v8 = vld [vmem:[%s1599_s7 + $0x10] sm:$0xff]  ;;  %v614_v13 = vld [vmem:[%s1599_s7 + $0x28] sm:$0xff] }
  0x34   :  { %1037 = vmatpush3.bf16.msra.mxu1 %v1036_v33  ;;  %v1057_v9 = vpack.c.bf16 %v610_v7, %v609_v6  ;;  %v613_v12 = vld [vmem:[%s1599_s7 + $0x20] sm:$0xff]  ;;  %v615_v20 = vld [vmem:[%s1599_s7 + $0x30] sm:$0xff]  ;;  %v616_v21 = vld [vmem:[%s1599_s7 + $0x38] sm:$0xff] }
  0x35   :  { %1016 = vmatpush3.bf16.msra.mxu0 %v1015_v10  ;;  %1038 = vmatprep.subr.bf16.mxu1 %v1100_v50  ;;  %v612_v10 = vld [vmem:[%s1599_s7 + $0x18] sm:$0xff]  ;;  %v1063_v14 = vpack.c.bf16 %v614_v13, %v613_v12  ;;  %v728_v15 = vld [vmem:[%s1596_s4] ss:$0 sm:$0xff] }
  0x36   :  { %1018 = vmatprep.subr.bf16.mxu0 %v1017_v11  ;;  %v1060_v11 = vpack.c.bf16 %v612_v10, %v611_v8 }
  0x38   :  { %1040 = vmatpush3.bf16.msra.mxu1 %v1039_v36 }
  0x39   :  { %1020 = vmatpush3.bf16.msra.mxu0 %v1019_v16  ;;  %1041 = vmatprep.subr.bf16.mxu1 %v1100_v50 }
  0x3a   :  { %1022 = vmatprep.subr.bf16.mxu0 %v1021_v17 }
  0x3c   :  { %1043 = vmatpush3.bf16.msra.mxu1 %v1042_v39 }
  0x3d   :  { %1024 = vmatpush3.bf16.msra.mxu0 %v1023_v22  ;;  %1044 = vmatprep.subr.bf16.mxu1 %v1100_v50  ;;  %v1066_v22 = vpack.c.bf16 %v616_v21, %v615_v20 }
  0x3e   :  { %1026 = vmatprep.subr.bf16.mxu0 %v1025_v23 }
  0x41   :  { %1028 = vmatpush3.bf16.msra.mxu0 %v1027_v26 }
  0x42   :  { %1056 = vmatprep.subr.bf16.mxu0 %v1100_v50 }
  0x44   :  { %354 = vmatmul.mubr.f32.vlgmr.msra.gmra.mrb[2].mxu0 %v37_v27  ;;  %v732_v27 = vld [vmem:[%s1600_s8] ss:$0 sm:$0xff] }
  0x45   :  { %930 = vmatprep.mubr.msk.f32.mxu0 %vm1101_vm0, %v1102_v60  ;;  %1058 = vmatpush3.bf16.msra.mxu0 %v1057_v9 }
  0x46   :  { %1059 = vmatprep.subr.bf16.mxu0 %v1100_v50 }
  0x49   :  { %1061 = vmatpush3.bf16.msra.mxu0 %v1060_v11 }
  0x4a   :  { %1062 = vmatprep.subr.bf16.mxu0 %v1100_v50 }
  0x4d   :  { %1064 = vmatpush3.bf16.msra.mxu0 %v1063_v14 }
  0x4e   :  { %1065 = vmatprep.subr.bf16.mxu0 %v1100_v50 }
  0x51   :  { %1067 = vmatpush3.bf16.msra.mxu0 %v1066_v22 }
  0xf7   :  { %v766_v40 = vpop.f32.mrb[0].mxu0 }
  0xf8   :  { %v767_v42 = vpop.f32.mrb[1].mxu0 }
  0xf9   :  { %v801_v43 = vpop.f32.mrb[0].mxu1  ;;  %v768_v44 = vadd.f32 %v767_v42, %v766_v40 }
  0xfa   :  { %v802_v45 = vpop.f32.mrb[1].mxu1 }
  0xfb   :  { %v803_v46 = vadd.f32 %v802_v45, %v801_v43  ;;  %v216_v47 = vadd.f32 %v768_v44, %v726_v41 }
  0xfd   :  { %v286_v48 = vadd.f32 %v803_v46, %v216_v47  ;;  %v425_v49 = vpop.f32.mrb[2].mxu1 }
  0xfe   :  { %v875_v51 = vpop.f32.mrb[3].mxu1 }
 0x117   :  { %v836_v52 = vpop.f32.mrb[2].mxu0 }
 0x118   :  { %v837_v53 = vpop.f32.mrb[3].mxu0 }
 0x119   :  { %v838_v54 = vadd.f32 %v837_v53, %v836_v52 }
 0x11b   :  { %v356_v55 = vadd.f32 %v838_v54, %v286_v48 }
 0x11d   :  { %v426_v58 = vadd.f32 %v425_v49, %v356_v55 }
 0x11f   :  { %v429_v61 = vmax.f32 %v426_v58, 0.0 }
 0x121   :  { %893 = vmatmul.mubr.msk.f32.vlgmr.msra.gmra.mrb[4].mxu1 %vm445_vm2, %v429_v61 }
 0x122   :  { %1046 = vmatpush3.bf16.msra.mxu1 %v1045_v59  ;;  %911 = vmatprep.mubr.msk.f32.mxu1 %vm1101_vm0, %v1102_v60  ;;  %v526_v60 = vld [vmem:[%s1597_s5 + $0x30] sm:$0xff] }
 0x123   :  { %1047 = vmatprep.subr.bf16.mxu1 %v1100_v50  ;;  %v1054_v5 = vpack.c.bf16 %v527_v4, %v526_v60 }
 0x126   :  { %1049 = vmatpush3.bf16.msra.mxu1 %v1048_v0 }
 0x127   :  { %1050 = vmatprep.subr.bf16.mxu1 %v1100_v50 }
 0x12a   :  { %1052 = vmatpush3.bf16.msra.mxu1 %v1051_v3 }
 0x12b   :  { %1053 = vmatprep.subr.bf16.mxu1 %v1100_v50  ;;  %v730_v50 = vld [vmem:[%s1598_s6] ss:$0 sm:$0xff]  ;;  %s1103_s6 = smov [#allocation2]  }
 0x12c   :  { %s718_s7 = sshll.u32 %s1103_s6, 4  ;;  %s719_s7 = int_to_ptr.vmem [resolvable:$true] %s718_s7 }
 0x12d   :  { %s1076_s8 = scalar_lea.vmem %s719_s7, 128  ;;  %p1081_p1 = scmp.lt.s32.totalorder %s719_s7, %s719_s7 }
 0x12e   :  { %1055 = vmatpush3.bf16.msra.mxu1 %v1054_v5  ;;  %p1077_p0 = scmp.ne.s32.totalorder %s719_s7, %s1076_s8  ;;  %p1082_p2 = scmp.lt.s32.totalorder %s1076_s8, %s1076_s8 }
 0x130   :  { %p1083_p3 = por %p1082_p2, %p1081_p1 }
 0x132   :  { %p1084_p4 = pnand %p1083_p3, %p1077_p0 }
 0x1f4   :  { %v515_v16 = vpop.f32.mrb[4].mxu1 }
 0x1f5   :  { %v516_v17 = vadd.f32 %v728_v15, %v515_v16  ;;  %v894_v18 = vpop.f32.mrb[5].mxu1 }
 0x1f7   :  { %v519_v19 = vmax.f32 %v516_v17, 0.0 }
 0x1f9   :  { %912 = vmatmul.mubr.msk.f32.vlgmr.msra.gmra.mrb[6].mxu1 %vm445_vm2, %v519_v19 }
 0x2cc   :  { %v604_v23 = vpop.f32.mrb[6].mxu1 }
 0x2cd   :  { %v605_v24 = vadd.f32 %v730_v50, %v604_v23  ;;  %v913_v25 = vpop.f32.mrb[7].mxu1 }
 0x2cf   :  { %v608_v26 = vmax.f32 %v605_v24, 0.0 }
 0x2d1   :  { %931 = vmatmul.mubr.msk.f32.vlgmr.msra.gmra.mrb[4].mxu0 %vm445_vm2, %v608_v26 }
 0x3a4   :  { %v693_v28 = vpop.f32.mrb[4].mxu0 }
 0x3a5   :  { %v694_v29 = vadd.f32 %v732_v27, %v693_v28  ;;  %v932_v30 = vpop.f32.mrb[5].mxu0 }
 0x3a7   :  { %v698_v31 = vsel %vm697_vm3, %v694_v29, -inf }
 0x3a8   :  { %699 = vmax.xlane.f32.xlu0 %v698_v31 }
 0x435   :  { %v700_v32 = vpop.xlane.xlu0 %699 }
 0x436   :  { %v701_v33 = vsub.f32 %v694_v29, %v700_v32 }
 0x438   :  { %v702_v34 = vmul.f32 1.442695, %v701_v33 }
 0x43a   :  { %1072 = vpow2.f32 %v702_v34 }
 0x444   :  { %v1073_v35 = vpop.eup %1072 }
 0x445   :  { %v704_v36 = vsel %vm697_vm3, %v1073_v35, 0.0 }
 0x446   :  { %705 = vadd.xlane.f32.xlu0 %v704_v36 }
 0x4d3   :  { %v706_v37 = vpop.xlane.xlu0 %705 }
 0x4d4   :  { %1074 = vlog2.f32 %v706_v37 }
 0x4de   :  { %v1075_v38 = vpop.eup %1074 }
 0x4df   :  { %v708_v39 = vmul.f32 0.6931472, %v1075_v38 }
 0x4e1   :  { %v709_v40 = vadd.f32 %v708_v39, %v700_v32 }
 0x4e3   :  { %v710_v41 = vsub.f32 %v694_v29, %v709_v40 }
 0x4e5   :  { %711 = vst.msk [vmem:[#allocation2] sm:$0xff] %vm697_vm3, %v710_v41 }
 0x4e6   :  { %1087 = shalt.err (!%p1084_p4)
}
 0x4e7   :  { %s1088_s0 = scalar_lea.hbm %s1601_s9, 128 }
 0x4e8   :  { %p1089_p5 = scmp.ne.s32.totalorder %s1601_s9, %s1088_s0  ;;  %p1092_p6 = scmp.lt.u32.totalorder %s1088_s0, %s1601_s9 }
 0x4ea   :  { %p1094_p7 = pnand %p1092_p6, %p1089_p5 }
 0x4ec   :  { %1097 = shalt.err (!%p1094_p7)
}
 0x4ed   :  { %721 = dma.vmem_to_hbm [thread:$0]  %s719_s7, 128, %s1601_s9, [#allocation3]  }
 0x4ee   :  { %1098 = dma.done.wait [#allocation3], 128  }
 0x4ef   :  { %1099 = vsyncadd [#allocation3], 4294967168 }
 0x4f0   :  { %725 = vsyncpa [#allocation3], 1 }

</bundles_post_ra>
